<compile_context>
chip_gen: v5e
topology: v5e:2x2
jax: 0.10.0
libtpu: 0.0.40
codegen_flags: <defaults>
</compile_context>

<pallas_src>
import jax
import jax.numpy as jnp
from jax import lax
from jax.experimental import pallas as pl
from jax.experimental.pallas import tpu as pltpu


# ---------------------------------------------------------------------------
# helpers
# ---------------------------------------------------------------------------
def _round_up(n, m):
    return ((n + m - 1) // m) * m


def _largest_divisor_leq(n, cap):
    for d in range(min(n, cap), 0, -1):
        if n % d == 0:
            return d
    return 1


def _pick_row_tiling(rows, cap=512):
    """rows is a multiple of 8.  Prefer an exact multiple-of-8 divisor (no padding);
    otherwise use `cap`-row tiles with padding."""
    best = 8
    for d in range(min(rows, cap), 7, -1):
        if rows % d == 0 and d % 8 == 0:
            best = d
            break
    if best >= min(rows, 256):
        return best, rows               # exact tiling, no padding
    row_tile = cap                       # rows > cap here
    return row_tile, _round_up(rows, row_tile)


def _pad_gate_rows(w, H, Hp):
    """Pad a (4H, ...) PyTorch-gate-packed tensor to (4Hp, ...), keeping each gate's
    block at offset k*Hp (zeros elsewhere).  Gate order: i, f, g, o."""
    pad_rows = Hp - H
    parts = []
    for k in range(4):
        blk = w[k * H:(k + 1) * H]
        if pad_rows:
            blk = jnp.pad(blk, ((0, pad_rows),) + ((0, 0),) * (w.ndim - 1))
        parts.append(blk)
    return jnp.concatenate(parts, axis=0)


# ---------------------------------------------------------------------------
# kernel 1: batched input projection  gates_x = X @ W_ih^T + b     (parallel)
# ---------------------------------------------------------------------------
def _input_proj_kernel(x_ref, wih_ref, b_ref, gx_ref):
    gx_ref[...] = (jnp.dot(x_ref[...], wih_ref[...],
                           preferred_element_type=jnp.float32)
                   + b_ref[...]).astype(gx_ref.dtype)


# ---------------------------------------------------------------------------
# kernel 2: serial LSTM recurrence over time chunks + fused Linear head
#           grid = (batch_tile [parallel], time_chunk [arbitrary])
# ---------------------------------------------------------------------------
def _lstm_recurrent_kernel(gx_ref, whh_ref, wd_ref, bd_ref, out_ref, h_sc, c_sc):
    Hp = h_sc.shape[1]
    t_chunk = gx_ref.shape[0]

    @pl.when(pl.program_id(1) == 0)
    def _():
        h_sc[...] = jnp.zeros_like(h_sc)
        c_sc[...] = jnp.zeros_like(c_sc)

    def step(s, carry):
        # Only the recurrent matmul lives on the serial path; the input projection was
        # hoisted into gates_x (gx_ref).
        gates = gx_ref[s].astype(jnp.float32) + jnp.dot(
            h_sc[...].astype(whh_ref.dtype), whh_ref[...],
            preferred_element_type=jnp.float32)
        # PyTorch gate order i, f, g, o; Hp is a multiple of 128 -> lane-dense slices.
        i_g = jax.nn.sigmoid(gates[:, 0 * Hp:1 * Hp])
        f_g = jax.nn.sigmoid(gates[:, 1 * Hp:2 * Hp])
        g_g = jnp.tanh(gates[:, 2 * Hp:3 * Hp])
        o_g = jax.nn.sigmoid(gates[:, 3 * Hp:4 * Hp])
        c_new = f_g * c_sc[...] + i_g * g_g
        c_sc[...] = c_new
        h_sc[...] = o_g * jnp.tanh(c_new)
        return carry

    lax.fori_loop(0, t_chunk, step, 0, unroll=True)

    # Dropout is identity in eval mode.  Linear head fused on the last chunk only; the
    # output block stays resident across the whole time axis (no init needed).
    @pl.when(pl.program_id(1) == pl.num_programs(1) - 1)
    def _():
        out_ref[...] = (jnp.dot(h_sc[...], wd_ref[...],
                                preferred_element_type=jnp.float32)
                        + bd_ref[...]).astype(out_ref.dtype)


# ---------------------------------------------------------------------------
# wrapper
# ---------------------------------------------------------------------------
def lstm_model_forward(x, w_ih, w_hh, b_ih, b_hh, w_dense, b_dense,
                       *, use_bf16=True, t_chunk=None, b_tile=None):
    """x: (B, T, D).  Returns (B, out_size) = Linear(LSTM(x)[:, -1, :])."""
    x = x.astype(jnp.float32)
    B, T, D = x.shape
    H = w_hh.shape[1]
    OUT = w_dense.shape[0]

    Bp = _round_up(B, 8)          # sublane multiple
    Hp = _round_up(H, 128)        # lane multiple -> lane-dense gate slices
    OUTp = _round_up(OUT, 128)    # lane-dense output store

    w_dtype = jnp.bfloat16 if use_bf16 else jnp.float32
    gx_dtype = w_dtype            # bf16 gates_x halves the HBM round trip on the perf path

    # --- parameter packing / padding (plain-JAX glue) ----------------------
    wih_t = _pad_gate_rows(w_ih, H, Hp).T.astype(w_dtype)                # (D, 4Hp)
    whh_p = _pad_gate_rows(w_hh, H, Hp)                                  # (4Hp, H)
    whh_t = jnp.pad(whh_p, ((0, 0), (0, Hp - H))).T.astype(w_dtype)      # (Hp, 4Hp)
    b = _pad_gate_rows((b_ih + b_hh).reshape(4 * H, 1), H, Hp)           # (4Hp, 1)
    b = b.reshape(1, 4 * Hp).astype(jnp.float32)
    wd_t = jnp.pad(w_dense, ((0, OUTp - OUT), (0, Hp - H))).T.astype(jnp.float32)  # (Hp, OUTp)
    bd = jnp.pad(b_dense, (0, OUTp - OUT)).reshape(1, OUTp).astype(jnp.float32)

    # --- phase 1: hoisted input projection over all timesteps --------------
    x_p = jnp.pad(x, ((0, Bp - B), (0, 0), (0, 0)))                      # (Bp, T, D)
    x_tm = jnp.transpose(x_p, (1, 0, 2)).reshape(T * Bp, D).astype(w_dtype)

    rows = T * Bp
    row_tile, rows_p = _pick_row_tiling(rows)
    n_row_tiles = rows_p // row_tile
    if rows_p != rows:
        x_tm = jnp.pad(x_tm, ((0, rows_p - rows), (0, 0)))

    gx = pl.pallas_call(
        _input_proj_kernel,
        out_shape=jax.ShapeDtypeStruct((rows_p, 4 * Hp), gx_dtype),
        grid_spec=pltpu.PrefetchScalarGridSpec(
            num_scalar_prefetch=0,
            grid=(n_row_tiles,),
            in_specs=[
                pl.BlockSpec((row_tile, D), lambda r: (r, 0)),
                pl.BlockSpec((D, 4 * Hp), lambda r: (0, 0)),
                pl.BlockSpec((1, 4 * Hp), lambda r: (0, 0)),
            ],
            out_specs=pl.BlockSpec((row_tile, 4 * Hp), lambda r: (r, 0)),
        ),
        compiler_params=pltpu.CompilerParams(
            dimension_semantics=("parallel",),
        ),
    )(x_tm, wih_t, b)

    if rows_p != rows:
        gx = gx[:rows]
    gx = gx.reshape(T, Bp, 4 * Hp)               # time-major gate pre-activations

    # --- phase 2: serial recurrence over (batch tile, time chunk) ----------
    if t_chunk is None:
        t_chunk = _largest_divisor_leq(T, 16)    # unrolled inner loop length
    n_chunks = T // t_chunk

    if b_tile is None:
        # Single batch tile by default (best on 1-TC chips).  On v7x, pass
        # b_tile = Bp // 2 (a multiple of 8) to shard the recurrence over both TensorCores.
        b_tile = Bp
    if Bp % b_tile != 0 or b_tile % 8 != 0:
        b_tile = Bp
    n_b_tiles = Bp // b_tile

    out_p = pl.pallas_call(
        _lstm_recurrent_kernel,
        out_shape=jax.ShapeDtypeStruct((Bp, OUTp), jnp.float32),
        grid_spec=pltpu.PrefetchScalarGridSpec(
            num_scalar_prefetch=0,
            grid=(n_b_tiles, n_chunks),
            in_specs=[
                pl.BlockSpec((t_chunk, b_tile, 4 * Hp), lambda bt, t: (t, bt, 0)),
                pl.BlockSpec((Hp, 4 * Hp), lambda bt, t: (0, 0)),
                pl.BlockSpec((Hp, OUTp), lambda bt, t: (0, 0)),
                pl.BlockSpec((1, OUTp), lambda bt, t: (0, 0)),
            ],
            out_specs=pl.BlockSpec((b_tile, OUTp), lambda bt, t: (bt, 0)),
            scratch_shapes=[
                pltpu.VMEM((b_tile, Hp), jnp.float32),   # h state (f32)
                pltpu.VMEM((b_tile, Hp), jnp.float32),   # c state (f32)
            ],
        ),
        compiler_params=pltpu.CompilerParams(
            dimension_semantics=("parallel", "arbitrary"),   # batch tiles independent, time serial
        ),
    )(gx, whh_t, wd_t, bd)

    return out_p[:B, :OUT]


# ---------------------------------------------------------------------------
# pure-JAX reference mirroring PyTorch nn.LSTM + Linear semantics (eval mode)
# ---------------------------------------------------------------------------
def _reference_forward(x, w_ih, w_hh, b_ih, b_hh, w_dense, b_dense):
    x = x.astype(jnp.float32)
    B, T, D = x.shape
    H = w_hh.shape[1]
    h = jnp.zeros((B, H), jnp.float32)
    c = jnp.zeros((B, H), jnp.float32)
    for t in range(T):
        gates = x[:, t, :] @ w_ih.T + h @ w_hh.T + b_ih + b_hh
        i = jax.nn.sigmoid(gates[:, 0 * H:1 * H])
        f = jax.nn.sigmoid(gates[:, 1 * H:2 * H])
        g = jnp.tanh(gates[:, 2 * H:3 * H])
        o = jax.nn.sigmoid(gates[:, 3 * H:4 * H])
        c = f * c + i * g
        h = o * jnp.tanh(c)
    return h @ w_dense.T + b_dense


if __name__ == "__main__":
    # Small shapes consistent with the module's forward: (B, T, input_size)
    B, T, D, H, OUT = 2, 8, 16, 32, 4

    key = jax.random.PRNGKey(0)
    kx, k1, k2, k3, k4, k5, k6 = jax.random.split(key, 7)

    scale = 1.0 / jnp.sqrt(jnp.float32(H))
    x = jax.random.normal(kx, (B, T, D), dtype=jnp.float32)
    w_ih = jax.random.uniform(k1, (4 * H, D), minval=-scale, maxval=scale, dtype=jnp.float32)
    w_hh = jax.random.uniform(k2, (4 * H, H), minval=-scale, maxval=scale, dtype=jnp.float32)
    b_ih = jax.random.uniform(k3, (4 * H,), minval=-scale, maxval=scale, dtype=jnp.float32)
    b_hh = jax.random.uniform(k4, (4 * H,), minval=-scale, maxval=scale, dtype=jnp.float32)
    w_dense = jax.random.uniform(k5, (OUT, H), minval=-scale, maxval=scale, dtype=jnp.float32)
    b_dense = jax.random.uniform(k6, (OUT,), minval=-scale, maxval=scale, dtype=jnp.float32)

    ref = _reference_forward(x, w_ih, w_hh, b_ih, b_hh, w_dense, b_dense)

    # f32 path: must match the PyTorch-semantics reference tightly.
    out_f32 = jax.block_until_ready(
        lstm_model_forward(x, w_ih, w_hh, b_ih, b_hh, w_dense, b_dense, use_bf16=False))
    assert out_f32.shape == (B, OUT), out_f32.shape
    assert jnp.allclose(out_f32, ref, atol=1e-4, rtol=1e-4), (out_f32, ref)

    # bf16-weight path (perf default): looser tolerance for the reduced-precision matmuls.
    out_bf16 = jax.block_until_ready(
        lstm_model_forward(x, w_ih, w_hh, b_ih, b_hh, w_dense, b_dense, use_bf16=True))
    assert out_bf16.shape == (B, OUT), out_bf16.shape
    assert jnp.allclose(out_bf16, ref, atol=5e-2, rtol=5e-2), (out_bf16, ref)

    print("KERNEL_OK")
</pallas_src>

<mosaic_0001>
module attributes {stable_mosaic.version = 11 : i64} {
  func.func @_input_proj_kernel(%arg0: i32, %arg1: memref<64x16xf32, #tpu.memory_space<vmem>>, %arg2: memref<16x512xf32, #tpu.memory_space<vmem>>, %arg3: memref<1x512xf32, #tpu.memory_space<vmem>>, %arg4: memref<64x512xf32, #tpu.memory_space<vmem>>) attributes {dimension_semantics = [#tpu.dimension_semantics<parallel>], iteration_bounds = array<i64: 1>, scalar_prefetch = 0 : i64, scratch_operands = 0 : i64, tpu.core_type = #tpu.core_type<tc>, window_params = [{transform_indices = @transform_0, window_bounds = array<i64: 64, 16>}, {pipeline_mode = #tpu.pipeline_mode<synchronous>, transform_indices = @transform_1, window_bounds = array<i64: 16, 512>}, {pipeline_mode = #tpu.pipeline_mode<synchronous>, transform_indices = @transform_2, window_bounds = array<i64: 1, 512>}, {transform_indices = @transform_3, window_bounds = array<i64: 64, 512>}]} {
    %c0 = arith.constant 0 : index
    %c0_0 = arith.constant 0 : index
    %0 = vector.load %arg1[%c0, %c0_0] : memref<64x16xf32, #tpu.memory_space<vmem>>, vector<64x16xf32>
    %c0_1 = arith.constant 0 : index
    %c0_2 = arith.constant 0 : index
    %1 = vector.load %arg2[%c0_1, %c0_2] : memref<16x512xf32, #tpu.memory_space<vmem>>, vector<16x512xf32>
    %cst = arith.constant dense<0.000000e+00> : vector<64x512xf32>
    %2 = tpu.matmul %0, %1, %cst {dimension_numbers = #tpu.dot_dimension_numbers<[1], [0], [0], [1], [0, 0, 1, 1], [], []>} : vector<64x16xf32>, vector<16x512xf32>, vector<64x512xf32> -> vector<64x512xf32>
    %c0_3 = arith.constant 0 : index
    %c0_4 = arith.constant 0 : index
    %3 = vector.load %arg3[%c0_3, %c0_4] : memref<1x512xf32, #tpu.memory_space<vmem>>, vector<1x512xf32>
    %4 = vector.broadcast %3 : vector<1x512xf32> to vector<64x512xf32>
    %5 = arith.addf %2, %4 : vector<64x512xf32>
    %c0_5 = arith.constant 0 : index
    %c0_6 = arith.constant 0 : index
    %6 = vector.load %arg4[%c0_5, %c0_6] : memref<64x512xf32, #tpu.memory_space<vmem>>, vector<64x512xf32>
    tpu.vector_store %arg4[%c0_5, %c0_6], %5 {strides = array<i32>} : memref<64x512xf32, #tpu.memory_space<vmem>>, vector<64x512xf32>,
    return
  }
  func.func @transform_0(%arg0: i32) -> (i32, i32) {
    %c0_i32 = arith.constant 0 : i32
    %c0_i32_0 = arith.constant 0 : i32
    return %arg0, %c0_i32 : i32, i32
  }
  func.func @transform_1(%arg0: i32) -> (i32, i32) {
    %c0_i32 = arith.constant 0 : i32
    %c0_i32_0 = arith.constant 0 : i32
    %c0_i32_1 = arith.constant 0 : i32
    return %c0_i32, %c0_i32_0 : i32, i32
  }
  func.func @transform_2(%arg0: i32) -> (i32, i32) {
    %c0_i32 = arith.constant 0 : i32
    %c0_i32_0 = arith.constant 0 : i32
    %c0_i32_1 = arith.constant 0 : i32
    return %c0_i32, %c0_i32_0 : i32, i32
  }
  func.func @transform_3(%arg0: i32) -> (i32, i32) {
    %c0_i32 = arith.constant 0 : i32
    %c0_i32_0 = arith.constant 0 : i32
    return %arg0, %c0_i32 : i32, i32
  }
}

</mosaic_0001>

<bundles_post_ra>
// kernel: tpu_custom_call.1
= control target key start
LH: loop header
LB: loop body
LE: loop exit
PB: predicated region body
PF: predicated region fallthrough
CT: control target
= control target key end

     0   :  { %vm41_vm0 = vcmask 130048   ;;  %s490_s0 = inlined_call_operand.vmem [shape: f32[64,16], index: 0, kind: input, shape index: {}]   ;;  %s491_s1 = inlined_call_operand.vmem [shape: f32[16,512], index: 1, kind: input, shape index: {}]   ;;  %s492_s2 = inlined_call_operand.vmem [shape: f32[1,512], index: 2, kind: input, shape index: {}]   ;;  %s493_s3 = inlined_call_operand.hbm [shape: f32[64,512], index: 3, kind: output, shape index: {}]  }
   0x1   :  { %v29_v0 = vld [vmem:[%s491_s1 + $0x30] sm:$0xff]  ;;  %v30_v1 = vld [vmem:[%s491_s1 + $0x38] sm:$0xff]  ;;  %v15_v4 = vld [vmem:[%s490_s0] sm:$0xff] }
   0x2   :  { %v25_v2 = vld [vmem:[%s491_s1 + $0x10] sm:$0xff]  ;;  %162 = vmatpush.msra.mxu2 %v29_v0  ;;  %203 = vmatpush.msra.mxu3 %v30_v1  ;;  %v26_v3 = vld [vmem:[%s491_s1 + $0x18] sm:$0xff]  ;;  %v27_v5 = vld [vmem:[%s491_s1 + $0x20] sm:$0xff] }
   0x3   :  { %80 = vmatpush.msra.mxu0 %v27_v5  ;;  %v28_v6 = vld [vmem:[%s491_s1 + $0x28] sm:$0xff]  ;;  %v23_v7 = vld [vmem:[%s491_s1] sm:$0xff] }
   0x4   :  { %163 = vmatpush.msra.mxu2 %v25_v2  ;;  %204 = vmatpush.msra.mxu3 %v26_v3  ;;  %v24_v8 = vld [vmem:[%s491_s1 + $0x8] sm:$0xff] }
   0x5   :  { %296 = vmatmul.msk.f32.vlgmr.msra.gmra.mxu2 %vm41_vm0, %v15_v4  ;;  %304 = vmatmul.msk.f32.vlgmr.msra.gmra.mxu3 %vm41_vm0, %v15_v4 }
   0x6   :  { %8 = vsyncpa [#allocation3], 0  ;;  %121 = vmatpush.msra.mxu1 %v28_v6  ;;  %81 = vmatpush.msra.mxu0 %v23_v7  ;;  %v16_v9 = vld [vmem:[%s490_s0 + $0x8] sm:$0xff]  ;;  %v17_v10 = vld [vmem:[%s490_s0 + $0x10] sm:$0xff]  ;;  %s268_s20 = sshll.u32 %s493_s3, 4  ;;  %s342_s21 = smov 512   ;;  %s269_s20 = int_to_ptr.hbm [resolvable:$true] %s268_s20 }
   0x7   :  { %280 = vmatmul.msk.f32.vlgmr.msra.gmra.mxu0 %vm41_vm0, %v15_v4  ;;  %v18_v11 = vld [vmem:[%s490_s0 + $0x18] sm:$0xff]  ;;  %v19_v12 = vld [vmem:[%s490_s0 + $0x20] sm:$0xff]  ;;  %v20_v13 = vld [vmem:[%s490_s0 + $0x28] sm:$0xff]  ;;  %s343_s22 = smov 32  }
   0x8   :  { %122 = vmatpush.msra.mxu1 %v24_v8  ;;  %v21_v14 = vld [vmem:[%s490_s0 + $0x30] sm:$0xff]  ;;  %v22_v15 = vld [vmem:[%s490_s0 + $0x38] sm:$0xff]  ;;  %v31_v16 = vld [vmem:[%s492_s2] sm:$0xf]  ;;  %s341_s0 = smov [#allocation2]  }
   0x9   :  { %288 = vmatmul.msk.f32.vlgmr.msra.gmra.mxu1 %vm41_vm0, %v15_v4  ;;  %v447_v17 = vperm.slane %v31_v16, 0  ;;  %v449_v18 = vperm.slane %v31_v16, 1  ;;  %v452_v21 = vperm.slane %v31_v16, 2  ;;  %v454_v22 = vperm.slane %v31_v16, 3  ;;  %s266_s2 = sshll.u32 %s341_s0, 4  ;;  %s267_s2 = int_to_ptr.vmem [resolvable:$true] %s266_s2 }
   0xd   :  { %297 = vmatmul.msk.f32.gmra.mxu2 %vm41_vm0, %v16_v9  ;;  %305 = vmatmul.msk.f32.gmra.mxu3 %vm41_vm0, %v16_v9 }
   0xf   :  { %281 = vmatmul.msk.f32.gmra.mxu0 %vm41_vm0, %v16_v9 }
  0x11   :  { %289 = vmatmul.msk.f32.gmra.mxu1 %vm41_vm0, %v16_v9 }
  0x15   :  { %298 = vmatmul.msk.f32.gmra.mxu2 %vm41_vm0, %v17_v10  ;;  %306 = vmatmul.msk.f32.gmra.mxu3 %vm41_vm0, %v17_v10 }
  0x17   :  { %282 = vmatmul.msk.f32.gmra.mxu0 %vm41_vm0, %v17_v10 }
  0x19   :  { %290 = vmatmul.msk.f32.gmra.mxu1 %vm41_vm0, %v17_v10 }
  0x1d   :  { %299 = vmatmul.msk.f32.gmra.mxu2 %vm41_vm0, %v18_v11  ;;  %307 = vmatmul.msk.f32.gmra.mxu3 %vm41_vm0, %v18_v11 }
  0x1f   :  { %283 = vmatmul.msk.f32.gmra.mxu0 %vm41_vm0, %v18_v11 }
  0x21   :  { %291 = vmatmul.msk.f32.gmra.mxu1 %vm41_vm0, %v18_v11 }
  0x25   :  { %300 = vmatmul.msk.f32.gmra.mxu2 %vm41_vm0, %v19_v12  ;;  %308 = vmatmul.msk.f32.gmra.mxu3 %vm41_vm0, %v19_v12 }
  0x27   :  { %284 = vmatmul.msk.f32.gmra.mxu0 %vm41_vm0, %v19_v12 }
  0x29   :  { %292 = vmatmul.msk.f32.gmra.mxu1 %vm41_vm0, %v19_v12 }
  0x2d   :  { %301 = vmatmul.msk.f32.gmra.mxu2 %vm41_vm0, %v20_v13  ;;  %309 = vmatmul.msk.f32.gmra.mxu3 %vm41_vm0, %v20_v13 }
  0x2f   :  { %285 = vmatmul.msk.f32.gmra.mxu0 %vm41_vm0, %v20_v13 }
  0x31   :  { %293 = vmatmul.msk.f32.gmra.mxu1 %vm41_vm0, %v20_v13 }
  0x35   :  { %302 = vmatmul.msk.f32.gmra.mxu2 %vm41_vm0, %v21_v14  ;;  %310 = vmatmul.msk.f32.gmra.mxu3 %vm41_vm0, %v21_v14 }
  0x37   :  { %286 = vmatmul.msk.f32.gmra.mxu0 %vm41_vm0, %v21_v14 }
  0x39   :  { %294 = vmatmul.msk.f32.gmra.mxu1 %vm41_vm0, %v21_v14 }
  0x3d   :  { %303 = vmatmul.msk.f32.gmra.mxu2 %vm41_vm0, %v22_v15  ;;  %311 = vmatmul.msk.f32.gmra.mxu3 %vm41_vm0, %v22_v15 }
  0x3f   :  { %287 = vmatmul.msk.f32.gmra.mxu0 %vm41_vm0, %v22_v15 }
  0x41   :  { %295 = vmatmul.msk.f32.gmra.mxu1 %vm41_vm0, %v22_v15 }
  0x84   :  { %v83_v19 = vpop.f32.mrf.mxu0 }
  0x85   :  { %v84_v20 = vadd.f32 %v83_v19, %v447_v17 }
  0x86   :  { %v124_v23 = vpop.f32.mrf.mxu1 }
  0x87   :  { %230 = vst [vmem:[#allocation2] sm:$0xff] %v84_v20  ;;  %v125_v24 = vadd.f32 %v124_v23, %v449_v18 }
  0x88   :  { %v165_v25 = vpop.f32.mrf.mxu2  ;;  %v206_v26 = vpop.f32.mrf.mxu3 }
  0x89   :  { %231 = vst [vmem:[#allocation2 + $0x8] sm:$0xff] %v125_v24  ;;  %v166_v27 = vadd.f32 %v165_v25, %v452_v21  ;;  %v207_v28 = vadd.f32 %v206_v26, %v454_v22 }
  0x8b   :  { %232 = vst [vmem:[#allocation2 + $0x10] sm:$0xff] %v166_v27 }
  0x8c   :  { %233 = vst [vmem:[#allocation2 + $0x18] sm:$0xff] %v207_v28  ;;  %v86_v29 = vpop.f32.mrf.mxu0 }
  0x8d   :  { %v87_v30 = vadd.f32 %v86_v29, %v447_v17 }
  0x8e   :  { %v127_v31 = vpop.f32.mrf.mxu1 }
  0x8f   :  { %234 = vst [vmem:[#allocation2 + $0x20] sm:$0xff] %v87_v30  ;;  %v128_v32 = vadd.f32 %v127_v31, %v449_v18 }
  0x90   :  { %v168_v33 = vpop.f32.mrf.mxu2  ;;  %v209_v34 = vpop.f32.mrf.mxu3 }
  0x91   :  { %235 = vst [vmem:[#allocation2 + $0x28] sm:$0xff] %v128_v32  ;;  %v169_v35 = vadd.f32 %v168_v33, %v452_v21  ;;  %v210_v36 = vadd.f32 %v209_v34, %v454_v22 }
  0x93   :  { %236 = vst [vmem:[#allocation2 + $0x30] sm:$0xff] %v169_v35 }
  0x94   :  { %237 = vst [vmem:[#allocation2 + $0x38] sm:$0xff] %v210_v36  ;;  %v89_v37 = vpop.f32.mrf.mxu0 }
  0x95   :  { %v90_v38 = vadd.f32 %v89_v37, %v447_v17 }
  0x96   :  { %v130_v39 = vpop.f32.mrf.mxu1 }
  0x97   :  { %238 = vst [vmem:[#allocation2 + $0x40] sm:$0xff] %v90_v38  ;;  %v131_v40 = vadd.f32 %v130_v39, %v449_v18 }
  0x98   :  { %v171_v41 = vpop.f32.mrf.mxu2  ;;  %v212_v42 = vpop.f32.mrf.mxu3 }
  0x99   :  { %239 = vst [vmem:[#allocation2 + $0x48] sm:$0xff] %v131_v40  ;;  %v172_v43 = vadd.f32 %v171_v41, %v452_v21  ;;  %v213_v44 = vadd.f32 %v212_v42, %v454_v22 }
  0x9b   :  { %240 = vst [vmem:[#allocation2 + $0x50] sm:$0xff] %v172_v43 }
  0x9c   :  { %241 = vst [vmem:[#allocation2 + $0x58] sm:$0xff] %v213_v44  ;;  %v92_v45 = vpop.f32.mrf.mxu0 }
  0x9d   :  { %v93_v46 = vadd.f32 %v92_v45, %v447_v17 }
  0x9e   :  { %v133_v47 = vpop.f32.mrf.mxu1 }
  0x9f   :  { %242 = vst [vmem:[#allocation2 + $0x60] sm:$0xff] %v93_v46  ;;  %v134_v48 = vadd.f32 %v133_v47, %v449_v18 }
  0xa0   :  { %v174_v49 = vpop.f32.mrf.mxu2  ;;  %v215_v50 = vpop.f32.mrf.mxu3 }
  0xa1   :  { %243 = vst [vmem:[#allocation2 + $0x68] sm:$0xff] %v134_v48  ;;  %v175_v51 = vadd.f32 %v174_v49, %v452_v21  ;;  %v216_v52 = vadd.f32 %v215_v50, %v454_v22 }
  0xa3   :  { %244 = vst [vmem:[#allocation2 + $0x70] sm:$0xff] %v175_v51 }
  0xa4   :  { %245 = vst [vmem:[#allocation2 + $0x78] sm:$0xff] %v216_v52  ;;  %v95_v53 = vpop.f32.mrf.mxu0 }
  0xa5   :  { %v96_v54 = vadd.f32 %v95_v53, %v447_v17 }
  0xa6   :  { %v136_v55 = vpop.f32.mrf.mxu1 }
  0xa7   :  { %246 = vst [vmem:[#allocation2 + $0x80] sm:$0xff] %v96_v54  ;;  %v137_v56 = vadd.f32 %v136_v55, %v449_v18 }
  0xa8   :  { %v177_v57 = vpop.f32.mrf.mxu2  ;;  %v218_v58 = vpop.f32.mrf.mxu3 }
  0xa9   :  { %247 = vst [vmem:[#allocation2 + $0x88] sm:$0xff] %v137_v56  ;;  %v178_v59 = vadd.f32 %v177_v57, %v452_v21  ;;  %v219_v60 = vadd.f32 %v218_v58, %v454_v22 }
  0xab   :  { %248 = vst [vmem:[#allocation2 + $0x90] sm:$0xff] %v178_v59 }
  0xac   :  { %249 = vst [vmem:[#allocation2 + $0x98] sm:$0xff] %v219_v60  ;;  %v98_v61 = vpop.f32.mrf.mxu0 }
  0xad   :  { %v99_v62 = vadd.f32 %v98_v61, %v447_v17 }
  0xae   :  { %v139_v63 = vpop.f32.mrf.mxu1 }
  0xaf   :  { %250 = vst [vmem:[#allocation2 + $0xa0] sm:$0xff] %v99_v62  ;;  %v140_v0 = vadd.f32 %v139_v63, %v449_v18 }
  0xb0   :  { %v180_v1 = vpop.f32.mrf.mxu2  ;;  %v221_v2 = vpop.f32.mrf.mxu3 }
  0xb1   :  { %251 = vst [vmem:[#allocation2 + $0xa8] sm:$0xff] %v140_v0  ;;  %v181_v3 = vadd.f32 %v180_v1, %v452_v21  ;;  %v222_v4 = vadd.f32 %v221_v2, %v454_v22 }
  0xb3   :  { %252 = vst [vmem:[#allocation2 + $0xb0] sm:$0xff] %v181_v3 }
  0xb4   :  { %253 = vst [vmem:[#allocation2 + $0xb8] sm:$0xff] %v222_v4  ;;  %v101_v5 = vpop.f32.mrf.mxu0 }
  0xb5   :  { %v102_v6 = vadd.f32 %v101_v5, %v447_v17 }
  0xb6   :  { %v142_v7 = vpop.f32.mrf.mxu1 }
  0xb7   :  { %254 = vst [vmem:[#allocation2 + $0xc0] sm:$0xff] %v102_v6  ;;  %v143_v8 = vadd.f32 %v142_v7, %v449_v18 }
  0xb8   :  { %v183_v9 = vpop.f32.mrf.mxu2  ;;  %v224_v10 = vpop.f32.mrf.mxu3 }
  0xb9   :  { %255 = vst [vmem:[#allocation2 + $0xc8] sm:$0xff] %v143_v8  ;;  %v184_v11 = vadd.f32 %v183_v9, %v452_v21  ;;  %v225_v12 = vadd.f32 %v224_v10, %v454_v22 }
  0xbb   :  { %256 = vst [vmem:[#allocation2 + $0xd0] sm:$0xff] %v184_v11 }
  0xbc   :  { %257 = vst [vmem:[#allocation2 + $0xd8] sm:$0xff] %v225_v12  ;;  %v104_v13 = vpop.f32.mrf.mxu0 }
  0xbd   :  { %v105_v14 = vadd.f32 %v104_v13, %v447_v17 }
  0xbe   :  { %v145_v15 = vpop.f32.mrf.mxu1 }
  0xbf   :  { %258 = vst [vmem:[#allocation2 + $0xe0] sm:$0xff] %v105_v14  ;;  %v146_v16 = vadd.f32 %v145_v15, %v449_v18 }
  0xc0   :  { %v186_v19 = vpop.f32.mrf.mxu2  ;;  %v227_v20 = vpop.f32.mrf.mxu3 }
  0xc1   :  { %259 = vst [vmem:[#allocation2 + $0xe8] sm:$0xff] %v146_v16  ;;  %v187_v23 = vadd.f32 %v186_v19, %v452_v21  ;;  %v228_v24 = vadd.f32 %v227_v20, %v454_v22 }
  0xc3   :  { %260 = vst [vmem:[#allocation2 + $0xf0] sm:$0xff] %v187_v23 }
  0xc4   :  { %261 = vst [vmem:[#allocation2 + $0xf8] sm:$0xff] %v228_v24 }
  0xc5   :  { %274 = dma.vmem_to_hbm [thread:$0]  %s267_s2, 4096, %s269_s20, [#allocation3], %s342_s21, %s342_s21, %s343_s22  }
  0xc6   :  { %339 = dma.done.wait [#allocation3], 4096  }
  0xc7   :  { %340 = vsyncadd [#allocation3], 4294963200 }
  0xc8   :  { %279 = vsyncpa [#allocation3], 1 }

</bundles_post_ra>
